<compile_context>
chip_gen: v5e
topology: v5e:2x2
jax: 0.10.0
libtpu: 0.0.40
codegen_flags: <defaults>
</compile_context>

<pallas_src>
import jax
import jax.numpy as jnp
from jax.experimental import pallas as pl
from jax.experimental.pallas import tpu as pltpu  # noqa: F401  (kept for parity)

ACT_DIM = 24

# Per-element affine applied after the (masked) tanh; lanes >= 6 are identity.
_SCALES = (0.0, 0.17, 0.6, 0.75, 0.6, 0.75)
_OFFSETS = (0.0, 0.17, -0.3, 0.75, 0.5, 0.75)


def _act_kernel(p_ref, o_ref):
    p = p_ref[...]  # (1, 24) f32
    lane = jax.lax.broadcasted_iota(jnp.int32, p.shape, 1)

    # First 6 params go through tanh (EUP); the rest pass through untouched.
    t = jnp.where(lane < 6, jnp.tanh(p), p)

    # Build scale/offset from scalar constants only (no captured array consts).
    scale = jnp.ones_like(p)
    offset = jnp.zeros_like(p)
    for i in range(6):
        scale = jnp.where(lane == i, jnp.float32(_SCALES[i]), scale)
        offset = jnp.where(lane == i, jnp.float32(_OFFSETS[i]), offset)

    o_ref[...] = t * scale + offset


@jax.jit
def _forward_jit(learned_params: jax.Array) -> jax.Array:
    p = learned_params.astype(jnp.float32).reshape(1, ACT_DIM)
    full_spec = pl.BlockSpec((1, ACT_DIM), lambda: (0, 0))
    out = pl.pallas_call(
        _act_kernel,
        out_shape=jax.ShapeDtypeStruct((1, ACT_DIM), jnp.float32),
        in_specs=[full_spec],
        out_specs=full_spec,
    )(p)
    return out.reshape(ACT_DIM)


def ff_hex_joint_phases_forward(learned_params: jax.Array,
                                x: jax.Array | None = None) -> jax.Array:
    """JAX/Pallas equivalent of FF_HEX_JOINT_PHASES.forward.

    `x` is accepted for signature parity but is unused (as in the PyTorch
    module). Returns a (24,) float32 action vector.
    """
    del x  # forward() never reads the observation
    return _forward_jit(learned_params)


def _reference_forward(learned_params):
    p = jnp.asarray(learned_params, jnp.float32)
    first6 = jnp.stack([
        jnp.tanh(p[0]) * 0.0,
        jnp.tanh(p[1]) * 0.17 + 0.17,
        jnp.tanh(p[2]) * 0.6 - 0.3,
        jnp.tanh(p[3]) * 0.75 + 0.75,
        jnp.tanh(p[4]) * 0.6 + 0.5,
        jnp.tanh(p[5]) * 0.75 + 0.75,
    ])
    return jnp.concatenate([first6, p[6:]])


if __name__ == "__main__":
    key = jax.random.PRNGKey(0)
    k_params, k_obs = jax.random.split(key)

    obs_dim = 18
    batch = 2
    # Deterministic "learned" parameters (the module inits them to 0.0; use
    # random values here so the tanh path is actually exercised).
    learned_params = jax.random.normal(k_params, (ACT_DIM,), jnp.float32)
    # Observation input — constructed for signature parity, unused by forward.
    x = jax.random.normal(k_obs, (batch, obs_dim), jnp.float32)

    act = ff_hex_joint_phases_forward(learned_params, x)
    act = jax.block_until_ready(act)

    ref = _reference_forward(learned_params)
    assert act.shape == (ACT_DIM,)
    assert jnp.allclose(act, ref, atol=1e-6, rtol=1e-6), (act, ref)

    print("KERNEL_OK")
</pallas_src>

<mosaic_0001>
module attributes {stable_mosaic.version = 11 : i64} {
  func.func @_act_kernel(%arg0: memref<1x24xf32, #tpu.memory_space<vmem>>, %arg1: memref<1x24xf32, #tpu.memory_space<vmem>>) attributes {dimension_semantics = [], scalar_prefetch = 0 : i64, scratch_operands = 0 : i64, tpu.core_type = #tpu.core_type<tc>} {
    %c0 = arith.constant 0 : index
    %c0_0 = arith.constant 0 : index
    %0 = vector.load %arg0[%c0, %c0_0] : memref<1x24xf32, #tpu.memory_space<vmem>>, vector<1x24xf32>
    %1 = tpu.iota {dimensions = array<i32: 1>} : vector<1x24xi32>
    %c6_i32 = arith.constant 6 : i32
    %2 = vector.broadcast %c6_i32 : i32 to vector<1x24xi32>
    %3 = arith.cmpi slt, %1, %2 : vector<1x24xi32>
    %4 = math.tanh %0 : vector<1x24xf32>
    %5 = arith.select %3, %4, %0 : vector<1x24xi1>, vector<1x24xf32>
    %cst = arith.constant 1.000000e+00 : f32
    %6 = vector.broadcast %cst : f32 to vector<1x24xf32>
    %cst_1 = arith.constant 0.000000e+00 : f32
    %7 = vector.broadcast %cst_1 : f32 to vector<1x24xf32>
    %c0_i32 = arith.constant 0 : i32
    %8 = vector.broadcast %c0_i32 : i32 to vector<1x24xi32>
    %9 = arith.cmpi eq, %1, %8 : vector<1x24xi32>
    %cst_2 = arith.constant 0.000000e+00 : f32
    %10 = vector.broadcast %cst_2 : f32 to vector<1x24xf32>
    %11 = arith.select %9, %10, %6 : vector<1x24xi1>, vector<1x24xf32>
    %c0_i32_3 = arith.constant 0 : i32
    %12 = vector.broadcast %c0_i32_3 : i32 to vector<1x24xi32>
    %13 = arith.cmpi eq, %1, %12 : vector<1x24xi32>
    %cst_4 = arith.constant 0.000000e+00 : f32
    %14 = vector.broadcast %cst_4 : f32 to vector<1x24xf32>
    %15 = arith.select %13, %14, %7 : vector<1x24xi1>, vector<1x24xf32>
    %c1_i32 = arith.constant 1 : i32
    %16 = vector.broadcast %c1_i32 : i32 to vector<1x24xi32>
    %17 = arith.cmpi eq, %1, %16 : vector<1x24xi32>
    %cst_5 = arith.constant 1.700000e-01 : f32
    %18 = vector.broadcast %cst_5 : f32 to vector<1x24xf32>
    %19 = arith.select %17, %18, %11 : vector<1x24xi1>, vector<1x24xf32>
    %c1_i32_6 = arith.constant 1 : i32
    %20 = vector.broadcast %c1_i32_6 : i32 to vector<1x24xi32>
    %21 = arith.cmpi eq, %1, %20 : vector<1x24xi32>
    %cst_7 = arith.constant 1.700000e-01 : f32
    %22 = vector.broadcast %cst_7 : f32 to vector<1x24xf32>
    %23 = arith.select %21, %22, %15 : vector<1x24xi1>, vector<1x24xf32>
    %c2_i32 = arith.constant 2 : i32
    %24 = vector.broadcast %c2_i32 : i32 to vector<1x24xi32>
    %25 = arith.cmpi eq, %1, %24 : vector<1x24xi32>
    %cst_8 = arith.constant 6.000000e-01 : f32
    %26 = vector.broadcast %cst_8 : f32 to vector<1x24xf32>
    %27 = arith.select %25, %26, %19 : vector<1x24xi1>, vector<1x24xf32>
    %c2_i32_9 = arith.constant 2 : i32
    %28 = vector.broadcast %c2_i32_9 : i32 to vector<1x24xi32>
    %29 = arith.cmpi eq, %1, %28 : vector<1x24xi32>
    %cst_10 = arith.constant -3.000000e-01 : f32
    %30 = vector.broadcast %cst_10 : f32 to vector<1x24xf32>
    %31 = arith.select %29, %30, %23 : vector<1x24xi1>, vector<1x24xf32>
    %c3_i32 = arith.constant 3 : i32
    %32 = vector.broadcast %c3_i32 : i32 to vector<1x24xi32>
    %33 = arith.cmpi eq, %1, %32 : vector<1x24xi32>
    %cst_11 = arith.constant 7.500000e-01 : f32
    %34 = vector.broadcast %cst_11 : f32 to vector<1x24xf32>
    %35 = arith.select %33, %34, %27 : vector<1x24xi1>, vector<1x24xf32>
    %c3_i32_12 = arith.constant 3 : i32
    %36 = vector.broadcast %c3_i32_12 : i32 to vector<1x24xi32>
    %37 = arith.cmpi eq, %1, %36 : vector<1x24xi32>
    %cst_13 = arith.constant 7.500000e-01 : f32
    %38 = vector.broadcast %cst_13 : f32 to vector<1x24xf32>
    %39 = arith.select %37, %38, %31 : vector<1x24xi1>, vector<1x24xf32>
    %c4_i32 = arith.constant 4 : i32
    %40 = vector.broadcast %c4_i32 : i32 to vector<1x24xi32>
    %41 = arith.cmpi eq, %1, %40 : vector<1x24xi32>
    %cst_14 = arith.constant 6.000000e-01 : f32
    %42 = vector.broadcast %cst_14 : f32 to vector<1x24xf32>
    %43 = arith.select %41, %42, %35 : vector<1x24xi1>, vector<1x24xf32>
    %c4_i32_15 = arith.constant 4 : i32
    %44 = vector.broadcast %c4_i32_15 : i32 to vector<1x24xi32>
    %45 = arith.cmpi eq, %1, %44 : vector<1x24xi32>
    %cst_16 = arith.constant 5.000000e-01 : f32
    %46 = vector.broadcast %cst_16 : f32 to vector<1x24xf32>
    %47 = arith.select %45, %46, %39 : vector<1x24xi1>, vector<1x24xf32>
    %c5_i32 = arith.constant 5 : i32
    %48 = vector.broadcast %c5_i32 : i32 to vector<1x24xi32>
    %49 = arith.cmpi eq, %1, %48 : vector<1x24xi32>
    %cst_17 = arith.constant 7.500000e-01 : f32
    %50 = vector.broadcast %cst_17 : f32 to vector<1x24xf32>
    %51 = arith.select %49, %50, %43 : vector<1x24xi1>, vector<1x24xf32>
    %c5_i32_18 = arith.constant 5 : i32
    %52 = vector.broadcast %c5_i32_18 : i32 to vector<1x24xi32>
    %53 = arith.cmpi eq, %1, %52 : vector<1x24xi32>
    %cst_19 = arith.constant 7.500000e-01 : f32
    %54 = vector.broadcast %cst_19 : f32 to vector<1x24xf32>
    %55 = arith.select %53, %54, %47 : vector<1x24xi1>, vector<1x24xf32>
    %56 = arith.mulf %5, %51 : vector<1x24xf32>
    %57 = arith.addf %56, %55 : vector<1x24xf32>
    %c0_20 = arith.constant 0 : index
    %c0_21 = arith.constant 0 : index
    %58 = vector.load %arg1[%c0_20, %c0_21] : memref<1x24xf32, #tpu.memory_space<vmem>>, vector<1x24xf32>
    tpu.vector_store %arg1[%c0_20, %c0_21], %57 {strides = array<i32>} : memref<1x24xf32, #tpu.memory_space<vmem>>, vector<1x24xf32>,
    return
  }
}

</mosaic_0001>

<bundles_post_ra>
// kernel: _forward_jit.1
= control target key start
LH: loop header
LB: loop body
LE: loop exit
PB: predicated region body
PF: predicated region fallthrough
CT: control target
= control target key end

     0   :  { %6 = vsyncpa [#allocation3], 0  ;;  %s145_s0 = inlined_call_operand.hbm [shape: f32[1,24], index: 0, kind: input, shape index: {}]   ;;  %s146_s1 = inlined_call_operand.hbm [shape: f32[1,24], index: 1, kind: output, shape index: {}]  }
   0x1   :  { %7 = vsyncpa [#allocation4], 0  ;;  %s13_s8 = sshll.u32 %s145_s0, 4  ;;  %s125_s9 = smov [#allocation2]   ;;  %s14_s8 = int_to_ptr.hbm [resolvable:$true] %s13_s8 }
   0x2   :  { %s15_s10 = sshll.u32 %s125_s9, 4  ;;  %s16_s10 = int_to_ptr.vmem [resolvable:$true] %s15_s10 }
   0x3   :  { %18 = dma.hbm_to_vmem [thread:$0]  %s14_s8, 16, %s16_s10, [#allocation3]  }
   0x4   :  { %121 = dma.done.wait [#allocation3], 16  }
   0x5   :  { %122 = vsyncadd [#allocation3], 4294967280  ;;  %v24_v0 = vlaneseq  ;;  %v126_v2 = vmov 1.0   ;;  %v127_v4 = vmov 0.0   ;;  %v23_v8 = vld [vmem:[#allocation2] sm:$0x1] }
   0x6   :  { %71 = vtanh.f32 %v23_v8  ;;  %s128_s0 = smov [#allocation5]   ;;  %s57_s14 = sshll.u32 %s146_s1, 4  ;;  %vm48_vm7 = vcmask 188416   ;;  %s58_s14 = int_to_ptr.hbm [resolvable:$true] %s57_s14 }
   0x7   :  { %v25_v1 = vand.u32 127, %v24_v0  ;;  %s55_s11 = sshll.u32 %s128_s0, 4  ;;  %s56_s11 = int_to_ptr.vmem [resolvable:$true] %s55_s11 }
   0x9   :  { %vm29_vm0 = vcmp.eq.s32.totalorder %v25_v1, 0  ;;  %vm31_vm1 = vcmp.eq.s32.totalorder %v25_v1, 1  ;;  %vm34_vm2 = vcmp.eq.s32.totalorder %v25_v1, 2  ;;  %vm37_vm3 = vcmp.eq.s32.totalorder %v25_v1, 3 }
   0xa   :  { %v30_v3 = vsel %vm29_vm0, 0.0, %v126_v2  ;;  %v33_v5 = vsel %vm31_vm1, 0.17, %v127_v4  ;;  %vm40_vm4 = vcmp.eq.s32.totalorder %v25_v1, 4  ;;  %vm43_vm5 = vcmp.eq.s32.totalorder %v25_v1, 5 }
   0xb   :  { %v32_v6 = vsel %vm31_vm1, 0.17, %v30_v3  ;;  %v36_v7 = vsel %vm34_vm2, -0.3, %v33_v5  ;;  %vm26_vm6 = vcmp.lt.s32.totalorder %v25_v1, 6 }
   0xc   :  { %v35_v9 = vsel %vm34_vm2, 0.6, %v32_v6  ;;  %v39_v11 = vsel %vm37_vm3, 0.75, %v36_v7  ;;  %v72_v15 = vpop.eup %71 }
   0xd   :  { %v38_v10 = vsel %vm37_vm3, 0.75, %v35_v9  ;;  %v42_v13 = vsel %vm40_vm4, 0.5, %v39_v11  ;;  %v28_v16 = vsel %vm26_vm6, %v72_v15, %v23_v8 }
   0xe   :  { %v41_v12 = vsel %vm40_vm4, 0.6, %v38_v10  ;;  %v45_v17 = vsel %vm43_vm5, 0.75, %v42_v13 }
   0xf   :  { %v44_v14 = vsel %vm43_vm5, 0.75, %v41_v12 }
  0x10   :  { %v46_v18 = vmul.f32 %v44_v14, %v28_v16 }
  0x12   :  { %v47_v19 = vadd.f32 %v46_v18, %v45_v17 }
  0x14   :  { %49 = vst.msk [vmem:[#allocation5] sm:$0x1] %vm48_vm7, %v47_v19 }
  0x15   :  { %60 = dma.vmem_to_hbm [thread:$0]  %s56_s11, 16, %s58_s14, [#allocation4]  }
  0x16   :  { %123 = dma.done.wait [#allocation4], 16  }
  0x17   :  { %124 = vsyncadd [#allocation4], 4294967280 }
  0x18   :  { %65 = vsyncpa [#allocation3], 1 }
  0x19   :  { %66 = vsyncpa [#allocation4], 1 }

</bundles_post_ra>
